<compile_context>
chip_gen: v7x
topology: tpu7x:2x2x1
jax: 0.10.0
libtpu: 0.0.40
codegen_flags: <defaults>
</compile_context>

<pallas_src>
import jax
import jax.numpy as jnp
from jax.experimental import pallas as pl
from jax.experimental.pallas import tpu as pltpu


def _cores_kernel(v0t_ref, v1_ref, v2_ref, o_ref):
    """Computes one (blk_rows, s1*s2) block of the flattened CP reconstruction.

    v0t_ref : (s0_pad, R)  mode-0 weight_v, transposed; resident across steps.
    v1_ref  : (R, s1)      mode-1 weight_v; resident across steps.
    v2_ref  : (R, s2)      mode-2 weight_v; resident across steps.
    o_ref   : (blk_rows, s1*s2) output row block (rows i*blk .. i*blk+blk-1 of s0).
    """
    i = pl.program_id(0)
    blk_rows = o_ref.shape[0]
    rank, s1 = v1_ref.shape
    s2 = v2_ref.shape[1]

    v0t = v0t_ref[...]
    v1 = v1_ref[...]
    v2 = v2_ref[...]

    # weight_norm with weight_g == 1 -> unit L2 norm per rank-row.  Each mode's
    # rsqrt is computed separately (no overflow of a product of squared norms).
    # Zero-norm rows give inf/NaN, same as PyTorch weight_norm.
    inv0 = jax.lax.rsqrt(jnp.sum(v0t * v0t, axis=0, keepdims=True))  # (1, R)
    inv1 = jax.lax.rsqrt(jnp.sum(v1 * v1, axis=1, keepdims=True))    # (R, 1)
    inv2 = jax.lax.rsqrt(jnp.sum(v2 * v2, axis=1, keepdims=True))    # (R, 1)

    # Lane-dense scaled Khatri-Rao slab of modes 1/2:
    #   kr[r, j*s2 + k] = w1[r, j] * w2[r, k]   (mode-1/2 norms folded into v1).
    w1s = v1 * (inv1 * inv2)                                          # (R, s1)
    kr = (w1s[:, :, None] * v2[:, None, :]).reshape(rank, s1 * s2)    # (R, s1*s2)

    # Normalized mode-0 rows for this block: (blk_rows, R), rank in lanes.
    start = pl.multiple_of(i * blk_rows, blk_rows)
    a_blk = v0t_ref[pl.ds(start, blk_rows), :] * inv0

    # Rank contraction on the MXU; HIGHEST precision for f32 parity (K = rank
    # is tiny, so the multi-pass cost is negligible).
    o_ref[...] = jnp.dot(
        a_blk, kr,
        precision=jax.lax.Precision.HIGHEST,
        preferred_element_type=jnp.float32,
    )


_TARGET_BLOCK_BYTES = 2 * 1024 * 1024  # ~2 MiB output blocks


def _cores_forward(v0, v1, v2):
    """v0/v1/v2: un-normalized weight_v factors, each of shape (rank, s_m)."""
    v0 = v0.astype(jnp.float32)
    v1 = v1.astype(jnp.float32)
    v2 = v2.astype(jnp.float32)
    rank, s0 = v0.shape
    _, s1 = v1.shape
    _, s2 = v2.shape
    n = s1 * s2
    row_bytes = 4 * n

    # Row-block size along s0: ~2 MiB output blocks, a multiple of 8 sublanes,
    # or the full dimension if it already fits.
    blk_rows = _TARGET_BLOCK_BYTES // row_bytes
    if blk_rows >= s0:
        blk_rows, s0_pad = s0, s0
    else:
        blk_rows = max(8, (blk_rows // 8) * 8)
        s0_pad = ((s0 + blk_rows - 1) // blk_rows) * blk_rows
    num_blocks = s0_pad // blk_rows

    # Mode-0 factor with rank in lanes; zero-pad s0 to a block multiple
    # (zero rows change neither the per-rank norms nor the kept outputs).
    v0t = v0.T
    if s0_pad != s0:
        v0t = jnp.pad(v0t, ((0, s0_pad - s0), (0, 0)))

    # Explicit VMEM budget: double-buffered output block + resident factors +
    # per-step Khatri-Rao intermediates, with 2x headroom.
    est = (
        2 * blk_rows * n                                   # output double buffer
        + 2 * (s0_pad * rank + rank * s1 + rank * s2)      # resident factors
        + 4 * rank * n                                     # kr build intermediates
        + 2 * blk_rows * rank                              # LHS block
        + blk_rows * n                                     # matmul result tile
    ) * 4
    vmem_limit = int(min(max(2 * est, 16 * 1024 * 1024), 64 * 1024 * 1024))

    out_flat = pl.pallas_call(
        _cores_kernel,
        grid=(num_blocks,),
        out_shape=jax.ShapeDtypeStruct((s0_pad, n), jnp.float32),
        in_specs=[
            pl.BlockSpec((s0_pad, rank), lambda i: (0, 0)),  # resident
            pl.BlockSpec((rank, s1), lambda i: (0, 0)),      # resident
            pl.BlockSpec((rank, s2), lambda i: (0, 0)),      # resident
        ],
        out_specs=pl.BlockSpec((blk_rows, n), lambda i: (i, 0)),
        compiler_params=pltpu.CompilerParams(
            dimension_semantics=("parallel",),
            vmem_limit_bytes=vmem_limit,
        ),
    )(v0t, v1, v2)

    # Row-major contiguous reshape (free) -> exactly the PyTorch output layout.
    return out_flat[:s0].reshape(s0, s1, s2)


cores_forward = jax.jit(_cores_forward)


if __name__ == "__main__":
    rank = 4
    shape_tuple = (8, 16, 128)

    # Deterministic parameter init. nn.Embedding initializes weight ~ N(0, 1);
    # weight_norm keeps it as weight_v, and the module forces weight_g = 1.
    key = jax.random.PRNGKey(0)
    keys = jax.random.split(key, len(shape_tuple))
    v_list = [
        jax.random.normal(k, (rank, s), dtype=jnp.float32)
        for k, s in zip(keys, shape_tuple)
    ]

    out = cores_forward(*v_list)
    out = jax.block_until_ready(out)

    # Exact-f32 (VPU broadcast-sum, no matmul-precision ambiguity) reference of
    # the PyTorch forward.
    w = [v / jnp.linalg.norm(v, axis=1, keepdims=True) for v in v_list]
    ref = (
        w[0][:, :, None, None]
        * w[1][:, None, :, None]
        * w[2][:, None, None, :]
    ).sum(axis=0)

    assert out.shape == shape_tuple, out.shape
    max_err = float(jnp.max(jnp.abs(out - ref)))
    assert jnp.allclose(out, ref, atol=1e-5, rtol=1e-5), max_err
    print("KERNEL_OK")
</pallas_src>

<mosaic_0001>
module attributes {stable_mosaic.version = 11 : i64} {
  func.func @_cores_kernel(%arg0: i32, %arg1: memref<8x4xf32, #tpu.memory_space<vmem>>, %arg2: memref<4x16xf32, #tpu.memory_space<vmem>>, %arg3: memref<4x128xf32, #tpu.memory_space<vmem>>, %arg4: memref<8x2048xf32, #tpu.memory_space<vmem>>) attributes {dimension_semantics = [#tpu.dimension_semantics<parallel>], iteration_bounds = array<i64: 1>, scalar_prefetch = 0 : i64, scratch_operands = 0 : i64, tpu.core_type = #tpu.core_type<tc>, window_params = [{pipeline_mode = #tpu.pipeline_mode<synchronous>, transform_indices = @transform_0, window_bounds = array<i64: 8, 4>}, {pipeline_mode = #tpu.pipeline_mode<synchronous>, transform_indices = @transform_1, window_bounds = array<i64: 4, 16>}, {pipeline_mode = #tpu.pipeline_mode<synchronous>, transform_indices = @transform_2, window_bounds = array<i64: 4, 128>}, {transform_indices = @transform_3, window_bounds = array<i64: 8, 2048>}]} {
    %c0 = arith.constant 0 : index
    %c0_0 = arith.constant 0 : index
    %0 = vector.load %arg1[%c0, %c0_0] : memref<8x4xf32, #tpu.memory_space<vmem>>, vector<8x4xf32>
    %c0_1 = arith.constant 0 : index
    %c0_2 = arith.constant 0 : index
    %1 = vector.load %arg2[%c0_1, %c0_2] : memref<4x16xf32, #tpu.memory_space<vmem>>, vector<4x16xf32>
    %c0_3 = arith.constant 0 : index
    %c0_4 = arith.constant 0 : index
    %2 = vector.load %arg3[%c0_3, %c0_4] : memref<4x128xf32, #tpu.memory_space<vmem>>, vector<4x128xf32>
    %3 = arith.mulf %0, %0 : vector<8x4xf32>
    %cst = arith.constant dense<0.000000e+00> : vector<4xf32>
    %4 = vector.multi_reduction <add>, %3, %cst [0] : vector<8x4xf32> to vector<4xf32>
    %5 = vector.shape_cast %4 : vector<4xf32> to vector<1x4xf32>
    %6 = math.rsqrt %5 : vector<1x4xf32>
    %7 = arith.mulf %1, %1 : vector<4x16xf32>
    %cst_5 = arith.constant dense<0.000000e+00> : vector<4xf32>
    %8 = vector.multi_reduction <add>, %7, %cst_5 [1] : vector<4x16xf32> to vector<4xf32>
    %9 = vector.shape_cast %8 : vector<4xf32> to vector<4x1xf32>
    %10 = math.rsqrt %9 : vector<4x1xf32>
    %11 = arith.mulf %2, %2 : vector<4x128xf32>
    %cst_6 = arith.constant dense<0.000000e+00> : vector<4xf32>
    %12 = vector.multi_reduction <add>, %11, %cst_6 [1] : vector<4x128xf32> to vector<4xf32>
    %13 = vector.shape_cast %12 : vector<4xf32> to vector<4x1xf32>
    %14 = math.rsqrt %13 : vector<4x1xf32>
    %15 = arith.mulf %10, %14 : vector<4x1xf32>
    %16 = vector.broadcast %15 : vector<4x1xf32> to vector<4x16xf32>
    %17 = arith.mulf %1, %16 : vector<4x16xf32>
    %18 = vector.shape_cast %17 : vector<4x16xf32> to vector<4x16x1xf32>
    %19 = vector.shape_cast %2 : vector<4x128xf32> to vector<4x1x128xf32>
    %20 = vector.broadcast %18 : vector<4x16x1xf32> to vector<4x16x128xf32>
    %21 = vector.broadcast %19 : vector<4x1x128xf32> to vector<4x16x128xf32>
    %22 = arith.mulf %20, %21 : vector<4x16x128xf32>
    %23 = vector.shape_cast %22 : vector<4x16x128xf32> to vector<4x2048xf32>
    %c8_i32 = arith.constant 8 : i32
    %24 = arith.muli %arg0, %c8_i32 : i32
    %25 = tpu.assume_multiple %24, 8 : i32
    %26 = arith.index_cast %25 : i32 to index
    %c0_7 = arith.constant 0 : index
    %27 = vector.load %arg1[%26, %c0_7] : memref<8x4xf32, #tpu.memory_space<vmem>>, vector<8x4xf32>
    %28 = vector.broadcast %6 : vector<1x4xf32> to vector<8x4xf32>
    %29 = arith.mulf %27, %28 : vector<8x4xf32>
    %cst_8 = arith.constant dense<0.000000e+00> : vector<8x2048xf32>
    %30 = tpu.matmul %29, %23, %cst_8 {dimension_numbers = #tpu.dot_dimension_numbers<[1], [0], [0], [1], [0, 0, 1, 1], [], []>, precision = #tpu.contract_precision<fp32>} : vector<8x4xf32>, vector<4x2048xf32>, vector<8x2048xf32> -> vector<8x2048xf32>
    %c0_9 = arith.constant 0 : index
    %c0_10 = arith.constant 0 : index
    %31 = vector.load %arg4[%c0_9, %c0_10] : memref<8x2048xf32, #tpu.memory_space<vmem>>, vector<8x2048xf32>
    tpu.vector_store %arg4[%c0_9, %c0_10], %30 {strides = array<i32>} : memref<8x2048xf32, #tpu.memory_space<vmem>>, vector<8x2048xf32>,
    return
  }
  func.func @transform_0(%arg0: i32) -> (i32, i32) {
    %c0_i32 = arith.constant 0 : i32
    %c0_i32_0 = arith.constant 0 : i32
    %c0_i32_1 = arith.constant 0 : i32
    return %c0_i32, %c0_i32_0 : i32, i32
  }
  func.func @transform_1(%arg0: i32) -> (i32, i32) {
    %c0_i32 = arith.constant 0 : i32
    %c0_i32_0 = arith.constant 0 : i32
    %c0_i32_1 = arith.constant 0 : i32
    return %c0_i32, %c0_i32_0 : i32, i32
  }
  func.func @transform_2(%arg0: i32) -> (i32, i32) {
    %c0_i32 = arith.constant 0 : i32
    %c0_i32_0 = arith.constant 0 : i32
    %c0_i32_1 = arith.constant 0 : i32
    return %c0_i32, %c0_i32_0 : i32, i32
  }
  func.func @transform_3(%arg0: i32) -> (i32, i32) {
    %c0_i32 = arith.constant 0 : i32
    %c0_i32_0 = arith.constant 0 : i32
    return %arg0, %c0_i32 : i32, i32
  }
}

</mosaic_0001>

<bundles_post_ra>
// kernel: _cores_forward.1
= control target key start
LH: loop header
LB: loop body
LE: loop exit
PB: predicated region body
PF: predicated region fallthrough
CT: control target
= control target key end

     0   :  { %vm28_vm0 = vcmask 125952   ;;  %vm34_vm1 = vcmask 1043456   ;;  %v41_v8 = vlaneseq  ;;  %v4159_v22 = vmov 0.0   ;;  %s4561_s1 = inlined_call_operand.vmem [shape: f32[4,16], index: 1, kind: input, shape index: {}]   ;;  %s4562_s2 = inlined_call_operand.vmem [shape: f32[4,128], index: 2, kind: input, shape index: {}]   ;;  %s4563_s0 = inlined_call_operand.vmem [shape: f32[8,4], index: 0, kind: input, shape index: {}]   ;;  %s4564_s3 = inlined_call_operand.vmem [shape: f32[8,2048], index: 3, kind: output, shape index: {}]  }
   0x1   :  { %v15_v0 = vld [vmem:[%s4561_s1] sm:$0xf]  ;;  %395 = vmatprep.mubr.f32.mxu0 %v4159_v22  ;;  %860 = vmatprep.mubr.f32.mxu1 %v4159_v22  ;;  %vm18_vm2 = vcmask 31744   ;;  %v4160_v31 = vmov 1966171168  }
   0x2   :  { %v16_v1 = vld [vmem:[%s4562_s2] sm:$0xf]  ;;  %v27_v2 = vmul.f32 %v15_v0, %v15_v0  ;;  %v4190_v9 = vshrl.u32 %v41_v8, 7  ;;  %v87_v32 = vunpack.c.l.s4 %v4160_v31  ;;  %v4161_v43 = vmov 1983009808  }
   0x3   :  { %v33_v3 = vmul.f32 %v16_v1, %v16_v1  ;;  %v14_v23 = vld [vmem:[%s4563_s0] sm:$0xff]  ;;  %v141_v44 = vunpack.c.l.s4 %v4161_v43  ;;  %v4162_v58 = vmov 1934713408  }
   0x4   :  { %v29_v4 = vsel %vm28_vm0, %v27_v2, 0.0  ;;  %v65_v13 = vsub.s32 2, %v4190_v9  ;;  %v43_v14 = vsub.s32 0, %v4190_v9  ;;  %v54_v18 = vsub.s32 1, %v4190_v9 }
   0x5   :  { %30 = vadd.xlane.f32.xlu0 %v29_v4  ;;  %v35_v5 = vsel %vm34_vm1, %v33_v3, 0.0  ;;  %v76_v20 = vsub.s32 3, %v4190_v9  ;;  %v17_v24 = vmul.f32 %v14_v23, %v14_v23  ;;  %v88_v34 = vunpack.c.0.s8 %v87_v32 }
   0x6   :  { %v142_v51 = vunpack.c.0.s8 %v141_v44  ;;  %v173_v59 = vunpack.c.l.s4 %v4162_v58 }
   0x7   :  { %v19_v25 = vsel %vm18_vm2, %v17_v24, 0.0  ;;  %v91_v35 = vsub.s32 %v88_v34, %v4190_v9 }
   0x8   :  { %v20_v26 = vrot.slane %v19_v25, 4  ;;  %v4211_v60 = vsub.s32 %v142_v51, %v4190_v9 }
   0x9   :  { %36 = vadd.xlane.f32.xlu0 %v35_v5  ;;  %v92_v36 = vrot.slane %v16_v1, %v91_v35  ;;  %v174_v1 = vunpack.c.0.s8 %v173_v59 }
   0xa   :  { %v21_v27 = vadd.f32 %v20_v26, %v19_v25 }
   0xb   :  { %v100_v37 = vrot.slane %v92_v36, %v91_v35  ;;  %v93_v39 = vcombine.high %v92_v36, %v92_v36 }
   0xc   :  { %v22_v28 = vrot.slane %v21_v27, 2 }
   0xd   :  { %v108_v40 = vcombine.high %v100_v37, %v100_v37  ;;  %v107_v42 = vrot.slane %v93_v39, %v91_v35  ;;  %v113_v47 = vrot.slane %v100_v37, %v43_v14 }
   0xe   :  { %v23_v29 = vadd.f32 %v22_v28, %v21_v27 }
   0xf   :  { %v121_v46 = vrot.slane %v108_v40, %v43_v14  ;;  %v109_v48 = vcombine.high %v107_v42, %v107_v42  ;;  %v117_v52 = vrot.slane %v107_v42, %v43_v14 }
  0x10   :  { %v24_v30 = vrot.slane %v23_v29, 1 }
  0x11   :  { %v125_v57 = vrot.slane %v109_v48, %v43_v14 }
  0x12   :  { %v25_v33 = vadd.f32 %v24_v30, %v23_v29 }
  0x92   :  { %v31_v6 = vpop.xlane.xlu0 %30 }
  0x93   :  { %4153 = vrsqrt.f32 %v31_v6 }
  0x96   :  { %v37_v7 = vpop.xlane.xlu0 %36 }
  0x97   :  { %4155 = vrsqrt.f32 %v37_v7  ;;  %v4226_v7 = vsub.s32 %v174_v1, %v4190_v9 }
  0x98   :  { %4157 = vrsqrt.f32 %v25_v33 }
  0x9d   :  { %v4154_v10 = vpop.eup %4153 }
  0xa1   :  { %v4156_v11 = vpop.eup %4155 }
  0xa2   :  { %v39_v12 = vmul.f32 %v4156_v11, %v4154_v10  ;;  %v4158_v38 = vpop.eup %4157 }
  0xa3   :  { %v277_v41 = vmul.f32 %v4158_v38, %v14_v23 }
  0xa4   :  { %v40_v15 = vmul.f32 %v39_v12, %v15_v0 }
  0xa5   :  { %v279_v49 = vsel %vm18_vm2, %v277_v41, 0 }
  0xa6   :  { %v66_v16 = vrot.slane %v40_v15, %v65_v13  ;;  %v44_v17 = vrot.slane %v40_v15, %v43_v14  ;;  %v55_v19 = vrot.slane %v40_v15, %v54_v18  ;;  %v77_v21 = vrot.slane %v40_v15, %v76_v20 }
  0xa7   :  { %v4204_v54 = vand.u32 4294901760, %v279_v49 }
  0xa8   :  { %68 = vbcast.lane.b32.xlu0 %v66_v16, 256  ;;  %46 = vbcast.lane.b32.xlu1 %v44_v17, 256 }
  0xa9   :  { %v4214_v62 = vsub.f32 %v279_v49, %v4204_v54 }
  0xab   :  { %v4222_v5 = vand.u32 4294901760, %v4214_v62 }
  0xac   :  { %57 = vbcast.lane.b32.xlu1 %v55_v19, 256 }
  0xad   :  { %v399_v13 = vsub.f32 %v4214_v62, %v4222_v5 }
  0xaf   :  { %v4241_v23 = vand.u32 4294901760, %v399_v13 }
  0xb0   :  { %79 = vbcast.lane.b32.xlu1 %v77_v21, 256 }
  0xb4   :  { %50 = vbcast.lane.b32.xlu1 %v44_v17, 264 }
  0xb8   :  { %61 = vbcast.lane.b32.xlu1 %v55_v19, 264 }
  0xbc   :  { %72 = vbcast.lane.b32.xlu1 %v66_v16, 264 }
  0xc0   :  { %83 = vbcast.lane.b32.xlu1 %v77_v21, 264 }
 0x11a   :  { %v47_v45 = vpop.permute.xlu1 %46  ;;  %v69_v50 = vpop.permute.xlu0 %68 }
 0x11b   :  { %v4206_v55 = vmul.f32 %v121_v46, %v69_v50  ;;  %v4208_v56 = vmul.f32 %v113_v47, %v47_v45 }
 0x11d   :  { %v138_v63 = vcombine.low %v4208_v56, %v4206_v55  ;;  %v139_v49 = vcombine.high %v4208_v56, %v4206_v55 }
 0x11e   :  { %v58_v53 = vpop.permute.xlu1 %57 }
 0x11f   :  { %v4218_v0 = vmul.f32 %v117_v52, %v58_v53  ;;  %v146_v6 = vrot.slane %v138_v63, %v4211_v60  ;;  %v153_v56 = vrot.slane %v139_v49, %v4211_v60 }
 0x122   :  { %v80_v61 = vpop.permute.xlu1 %79 }
 0x123   :  { %v136_v2 = vmul.f32 %v125_v57, %v80_v61 }
 0x125   :  { %v154_v3 = vcombine.low %v4218_v0, %v136_v2  ;;  %v155_v43 = vcombine.high %v4218_v0, %v136_v2 }
 0x126   :  { %v51_v4 = vpop.permute.xlu1 %50 }
 0x127   :  { %v162_v8 = vrot.slane %v154_v3, %v4211_v60  ;;  %v131_v24 = vmul.f32 %v113_v47, %v51_v4  ;;  %v169_v58 = vrot.slane %v155_v43, %v4211_v60 }
 0x129   :  { %v170_v10 = vcombine.low %v146_v6, %v162_v8  ;;  %v171_v11 = vcombine.high %v146_v6, %v162_v8 }
 0x12a   :  { %v62_v12 = vpop.permute.xlu1 %61 }
 0x12b   :  { %v178_v14 = vrot.slane %v170_v10, %v4226_v7  ;;  %v185_v15 = vrot.slane %v171_v11, %v4226_v7  ;;  %v133_v32 = vmul.f32 %v117_v52, %v62_v12  ;;  %v187_v11 = vcombine.high %v153_v56, %v169_v58 }
 0x12d   :  { %v202_v16 = vcombine.high %v178_v14, %v4159_v22  ;;  %v203_v17 = vcombine.high %v185_v15, %v4159_v22  ;;  %v282_v18 = vsel %vm34_vm1, %v178_v14, 0  ;;  %v288_v9 = vsel %vm34_vm1, %v185_v15, 0 }
 0x12e   :  { %v73_v19 = vpop.permute.xlu1 %72  ;;  %v4237_v20 = vand.u32 4294901760, %v282_v18  ;;  %v4239_v21 = vand.u32 4294901760, %v288_v9  ;;  %v201_v13 = vrot.slane %v187_v11, %v4226_v7 }
 0x12f   :  { %v135_v25 = vmul.f32 %v121_v46, %v73_v19  ;;  %v285_v26 = vsel %vm34_vm1, %v202_v16, 0  ;;  %v291_v27 = vsel %vm34_vm1, %v203_v17, 0 }
 0x130   :  { %v4245_v28 = vand.u32 4294901760, %v285_v26  ;;  %v4247_v29 = vand.u32 4294901760, %v291_v27  ;;  %v4250_v30 = vsub.f32 %v282_v18, %v4237_v20  ;;  %v4253_v31 = vsub.f32 %v288_v9, %v4239_v21 }
 0x131   :  { %v206_v33 = vcombine.low %v131_v24, %v135_v25  ;;  %v207_v34 = vcombine.high %v131_v24, %v135_v25  ;;  %v205_v15 = vcombine.high %v201_v13, %v4159_v22  ;;  %v300_v19 = vsel %vm34_vm1, %v201_v13, 0 }
 0x132   :  { %330 = vmatprep.subr.mxu0 %v4245_v28  ;;  %795 = vmatprep.subr.mxu1 %v4247_v29  ;;  %v84_v35 = vpop.permute.xlu1 %83  ;;  %v408_v36 = vsub.f32 %v285_v26, %v4245_v28  ;;  %v4259_v37 = vsub.f32 %v291_v27, %v4247_v29  ;;  %v415_v38 = vand.u32 4294901760, %v4250_v30  ;;  %v880_v39 = vand.u32 4294901760, %v4253_v31 }
 0x133   :  { %v214_v40 = vrot.slane %v206_v33, %v4211_v60  ;;  %v221_v41 = vrot.slane %v207_v34, %v4211_v60  ;;  %v137_v42 = vmul.f32 %v125_v57, %v84_v35  ;;  %332 = vmatpush1.msra.mxu0 %v4237_v20  ;;  %797 = vmatpush1.msra.mxu1 %v4239_v21  ;;  %v303_v16 = vsel %vm34_vm1, %v205_v15, 0 }
 0x134   :  { %401 = vmatmul.mubr.f32.vlgmr.msra.gmra.mrb[0].mxu0 %v4241_v23  ;;  %866 = vmatmul.mubr.f32.vlgmr.msra.gmra.mrb[0].mxu1 %v4241_v23  ;;  %v409_v44 = vand.u32 4294901760, %v408_v36  ;;  %v874_v45 = vand.u32 4294901760, %v4259_v37  ;;  %v416_v46 = vsub.f32 %v4250_v30, %v415_v38  ;;  %v881_v52 = vsub.f32 %v4253_v31, %v880_v39 }
 0x135   :  { %v222_v47 = vcombine.low %v133_v32, %v137_v42  ;;  %v223_v48 = vcombine.high %v133_v32, %v137_v42  ;;  %481 = vmatprep.mubr.f32.mxu0 %v4159_v22  ;;  %946 = vmatprep.mubr.f32.mxu1 %v4159_v22  ;;  %v4326_v9 = vand.u32 4294901760, %v303_v16  ;;  %v4337_v25 = vand.u32 4294901760, %v300_v19 }
 0x136   :  { %v410_v50 = vsub.f32 %v408_v36, %v409_v44  ;;  %v875_v51 = vsub.f32 %v4259_v37, %v874_v45  ;;  %v417_v63 = vand.u32 4294901760, %v416_v46  ;;  %v882_v3 = vand.u32 4294901760, %v881_v52 }
 0x137   :  { %v230_v53 = vrot.slane %v222_v47, %v4211_v60  ;;  %v237_v57 = vrot.slane %v223_v48, %v4211_v60  ;;  %v186_v60 = vcombine.low %v153_v56, %v169_v58  ;;  %v1803_v27 = vsub.f32 %v303_v16, %v4326_v9 }
 0x138   :  { %v411_v59 = vand.u32 4294901760, %v410_v50  ;;  %v876_v61 = vand.u32 4294901760, %v875_v51 }
 0x139   :  { %v238_v0 = vcombine.low %v214_v40, %v230_v53  ;;  %v239_v1 = vcombine.high %v214_v40, %v230_v53  ;;  %v254_v2 = vcombine.low %v221_v41, %v237_v57  ;;  %v255_v55 = vcombine.high %v221_v41, %v237_v57 }
 0x13a   :  { %412 = vmatprep.subr.mxu0 %v411_v59  ;;  %877 = vmatprep.subr.mxu1 %v876_v61  ;;  %v194_v12 = vrot.slane %v186_v60, %v4226_v7 }
 0x13b   :  { %v4287_v4 = vrot.slane %v238_v0, %v4226_v7  ;;  %v4290_v6 = vrot.slane %v239_v1, %v4226_v7  ;;  %v4293_v8 = vrot.slane %v254_v2, %v4226_v7  ;;  %v4296_v10 = vrot.slane %v255_v55, %v4226_v7  ;;  %418 = vmatpush1.msra.mxu0 %v417_v63 }
 0x13c   :  { %883 = vmatpush1.msra.mxu1 %v882_v3  ;;  %483 = vmatmul.mubr.f32.vlgmr.msra.gmra.mrb[0].mxu0 %v4204_v54  ;;  %v204_v14 = vcombine.high %v194_v12, %v4159_v22  ;;  %v294_v18 = vsel %vm34_vm1, %v194_v12, 0 }
 0x13d   :  { %491 = vmatprep.subr.mxu0 %v408_v36  ;;  %948 = vmatmul.mubr.f32.vlgmr.msra.gmra.mrb[0].mxu1 %v4204_v54  ;;  %v4334_v24 = vand.u32 4294901760, %v294_v18  ;;  %v270_v40 = vcombine.high %v4287_v4, %v4159_v22  ;;  %v271_v41 = vcombine.high %v4290_v6, %v4159_v22  ;;  %v312_v47 = vsel %vm34_vm1, %v4290_v6, 0 }
 0x13e   :  { %956 = vmatprep.subr.mxu1 %v4259_v37  ;;  %494 = vmatpush1.msra.mxu0 %v4250_v30  ;;  %v297_v7 = vsel %vm34_vm1, %v204_v14, 0  ;;  %v4400_v49 = vand.u32 4294901760, %v312_v47  ;;  %v272_v6 = vcombine.high %v4293_v8, %v4159_v22  ;;  %v273_v60 = vcombine.high %v4296_v10, %v4159_v22 }
 0x13f   :  { %959 = vmatpush1.msra.mxu1 %v4253_v31  ;;  %567 = vmatprep.subr.mxu0 %v4245_v28  ;;  %v4320_v17 = vand.u32 4294901760, %v297_v7  ;;  %v1344_v30 = vsub.f32 %v294_v18, %v4334_v24  ;;  %v1804_v31 = vand.u32 4294901760, %v1803_v27  ;;  %v309_v42 = vsel %vm34_vm1, %v270_v40, 0 }
 0x140   :  { %1032 = vmatprep.subr.mxu1 %v4247_v29  ;;  %557 = vmatprep.mubr.f32.mxu0 %v4159_v22  ;;  %v315_v43 = vsel %vm34_vm1, %v271_v41, 0  ;;  %v4407_v53 = vsub.f32 %v312_v47, %v4400_v49  ;;  %v321_v11 = vsel %vm34_vm1, %v272_v6, 0  ;;  %v327_v12 = vsel %vm34_vm1, %v273_v60, 0 }
 0x141   :  { %1022 = vmatprep.mubr.f32.mxu1 %v4159_v22  ;;  %v1338_v26 = vsub.f32 %v297_v7, %v4320_v17  ;;  %v1345_v32 = vand.u32 4294901760, %v1344_v30  ;;  %v1805_v35 = vsub.f32 %v1803_v27, %v1804_v31  ;;  %v4390_v46 = vand.u32 4294901760, %v315_v43 }
 0x142   :  { %v2740_v63 = vand.u32 4294901760, %v4407_v53  ;;  %v4448_v13 = vand.u32 4294901760, %v321_v11  ;;  %v318_v14 = vsel %vm34_vm1, %v4293_v8, 0  ;;  %v4453_v15 = vand.u32 4294901760, %v327_v12 }
 0x143   :  { %v1346_v36 = vsub.f32 %v1344_v30, %v1345_v32  ;;  %v2733_v51 = vsub.f32 %v315_v43, %v4390_v46  ;;  %v324_v7 = vsel %vm34_vm1, %v4296_v10, 0  ;;  %v4460_v16 = vand.u32 4294901760, %v318_v14 }
 0x144   :  { %560 = vmatmul.mubr.f32.vlgmr.msra.gmra.mrb[0].mxu0 %v4214_v62  ;;  %v2741_v55 = vsub.f32 %v4407_v53, %v2740_v63  ;;  %v4463_v8 = vand.u32 4294901760, %v324_v7  ;;  %v3663_v18 = vsub.f32 %v327_v12, %v4453_v15 }
 0x145   :  { %569 = vmatpush1.msra.mxu0 %v4237_v20  ;;  %1025 = vmatmul.mubr.f32.vlgmr.msra.gmra.mrb[0].mxu1 %v4214_v62  ;;  %v2734_v58 = vand.u32 4294901760, %v2733_v51 }
 0x146   :  { %1034 = vmatpush1.msra.mxu1 %v4239_v21  ;;  %645 = vmatprep.subr.mxu0 %v409_v44  ;;  %v4385_v44 = vand.u32 4294901760, %v309_v42  ;;  %v3669_v10 = vsub.f32 %v324_v7, %v4463_v8 }
 0x147   :  { %1110 = vmatprep.subr.mxu1 %v874_v45  ;;  %632 = vmatprep.mubr.f32.mxu0 %v4159_v22  ;;  %v306_v45 = vsel %vm34_vm1, %v4287_v4, 0  ;;  %v2735_v0 = vsub.f32 %v2733_v51, %v2734_v58  ;;  %v2742_v4 = vand.u32 4294901760, %v2741_v55 }
 0x148   :  { %1097 = vmatprep.mubr.f32.mxu1 %v4159_v22  ;;  %v4397_v48 = vand.u32 4294901760, %v306_v45  ;;  %v2268_v50 = vsub.f32 %v309_v42, %v4385_v44 }
 0x149   :  { %v2736_v56 = vand.u32 4294901760, %v2735_v0 }
 0x14a   :  { %v2274_v52 = vsub.f32 %v306_v45, %v4397_v48  ;;  %v2269_v57 = vand.u32 4294901760, %v2268_v50 }
 0x14c   :  { %636 = vmatmul.mubr.f32.vlgmr.msra.gmra.mrb[0].mxu0 %v4222_v5  ;;  %v2275_v59 = vand.u32 4294901760, %v2274_v52  ;;  %v2270_v61 = vsub.f32 %v2268_v50, %v2269_v57 }
 0x14d   :  { %649 = vmatpush1.msra.mxu0 %v415_v38  ;;  %1101 = vmatmul.mubr.f32.vlgmr.msra.gmra.mrb[0].mxu1 %v4222_v5  ;;  %v1347_v38 = vand.u32 4294901760, %v1346_v36 }
 0x14e   :  { %1114 = vmatpush1.msra.mxu1 %v880_v39  ;;  %721 = vmatprep.subr.mxu0 %v4245_v28  ;;  %v4344_v28 = vsub.f32 %v300_v19, %v4337_v25  ;;  %v2276_v1 = vsub.f32 %v2274_v52, %v2275_v59  ;;  %v2271_v2 = vand.u32 4294901760, %v2270_v61 }
 0x14f   :  { %1186 = vmatprep.subr.mxu1 %v4247_v29  ;;  %712 = vmatprep.mubr.f32.mxu0 %v4159_v22  ;;  %v1339_v29 = vand.u32 4294901760, %v1338_v26 }
 0x150   :  { %1177 = vmatprep.mubr.f32.mxu1 %v4159_v22  ;;  %v1810_v34 = vand.u32 4294901760, %v4344_v28  ;;  %v2277_v3 = vand.u32 4294901760, %v2276_v1 }
 0x151   :  { %v1340_v33 = vsub.f32 %v1338_v26, %v1339_v29 }
 0x152   :  { %v1811_v37 = vsub.f32 %v4344_v28, %v1810_v34 }
 0x154   :  { %714 = vmatmul.mubr.f32.vlgmr.msra.gmra.mrb[0].mxu0 %v4204_v54  ;;  %v1812_v39 = vand.u32 4294901760, %v1811_v37 }
 0x155   :  { %723 = vmatpush1.msra.mxu0 %v4237_v20  ;;  %1179 = vmatmul.mubr.f32.vlgmr.msra.gmra.mrb[0].mxu1 %v4204_v54  ;;  %v1341_v20 = vand.u32 4294901760, %v1340_v33 }
 0x156   :  { %1188 = vmatpush1.msra.mxu1 %v4239_v21  ;;  %1260 = vmatprep.subr.mxu0 %v4320_v17  ;;  %v1806_v21 = vand.u32 4294901760, %v1805_v35 }
 0x157   :  { %1725 = vmatprep.subr.mxu1 %v4326_v9  ;;  %786 = vmatprep.mubr.f32.mxu0 %v4159_v22 }
 0x158   :  { %1251 = vmatprep.mubr.f32.mxu1 %v4159_v22 }
 0x15c   :  { %788 = vmatmul.mubr.f32.vlgmr.msra.gmra.mrb[0].mxu0 %v4204_v54 }
 0x15d   :  { %1253 = vmatmul.mubr.f32.vlgmr.msra.gmra.mrb[0].mxu1 %v4204_v54  ;;  %1262 = vmatpush1.msra.mxu0 %v4334_v24 }
 0x15e   :  { %1727 = vmatpush1.msra.mxu1 %v4337_v25  ;;  %1342 = vmatprep.subr.mxu0 %v1341_v20 }
 0x15f   :  { %1807 = vmatprep.subr.mxu1 %v1806_v21  ;;  %1325 = vmatprep.mubr.f32.mxu0 %v4159_v22 }
 0x160   :  { %1790 = vmatprep.mubr.f32.mxu1 %v4159_v22  ;;  %1331 = vmatmul.mubr.f32.vlgmr.msra.gmra.mrb[2].mxu0 %v4241_v23 }
 0x161   :  { %1348 = vmatpush1.msra.mxu0 %v1347_v38  ;;  %1796 = vmatmul.mubr.f32.vlgmr.msra.gmra.mrb[2].mxu1 %v4241_v23 }
 0x162   :  { %1813 = vmatpush1.msra.mxu1 %v1812_v39  ;;  %1421 = vmatprep.subr.mxu0 %v1338_v26 }
 0x163   :  { %1886 = vmatprep.subr.mxu1 %v1803_v27  ;;  %1411 = vmatprep.mubr.f32.mxu0 %v4159_v22  ;;  %v3670_v27 = vand.u32 4294901760, %v3669_v10 }
 0x164   :  { %1876 = vmatprep.mubr.f32.mxu1 %v4159_v22 }
 0x168   :  { %1413 = vmatmul.mubr.f32.vlgmr.msra.gmra.mrb[2].mxu0 %v4204_v54 }
 0x169   :  { %1424 = vmatpush1.msra.mxu0 %v1344_v30  ;;  %1878 = vmatmul.mubr.f32.vlgmr.msra.gmra.mrb[2].mxu1 %v4204_v54 }
 0x16a   :  { %1889 = vmatpush1.msra.mxu1 %v4344_v28  ;;  %1497 = vmatprep.subr.mxu0 %v4320_v17 }
 0x16b   :  { %1962 = vmatprep.subr.mxu1 %v4326_v9  ;;  %1487 = vmatprep.mubr.f32.mxu0 %v4159_v22 }
 0x16c   :  { %1952 = vmatprep.mubr.f32.mxu1 %v4159_v22 }
 0x170   :  { %1490 = vmatmul.mubr.f32.vlgmr.msra.gmra.mrb[2].mxu0 %v4214_v62 }
 0x171   :  { %1499 = vmatpush1.msra.mxu0 %v4334_v24  ;;  %1955 = vmatmul.mubr.f32.vlgmr.msra.gmra.mrb[2].mxu1 %v4214_v62 }
 0x172   :  { %1964 = vmatpush1.msra.mxu1 %v4337_v25  ;;  %1575 = vmatprep.subr.mxu0 %v1339_v29 }
 0x173   :  { %2040 = vmatprep.subr.mxu1 %v1804_v31  ;;  %1562 = vmatprep.mubr.f32.mxu0 %v4159_v22  ;;  %v3671_v31 = vsub.f32 %v3669_v10, %v3670_v27 }
 0x174   :  { %2027 = vmatprep.mubr.f32.mxu1 %v4159_v22 }
 0x178   :  { %1566 = vmatmul.mubr.f32.vlgmr.msra.gmra.mrb[2].mxu0 %v4222_v5 }
 0x179   :  { %1579 = vmatpush1.msra.mxu0 %v1345_v32  ;;  %2031 = vmatmul.mubr.f32.vlgmr.msra.gmra.mrb[2].mxu1 %v4222_v5 }
 0x17a   :  { %2044 = vmatpush1.msra.mxu1 %v1810_v34  ;;  %1651 = vmatprep.subr.mxu0 %v4320_v17  ;;  %v3198_v17 = vsub.f32 %v321_v11, %v4448_v13  ;;  %v3672_v34 = vand.u32 4294901760, %v3671_v31 }
 0x17b   :  { %2116 = vmatprep.subr.mxu1 %v4326_v9  ;;  %1642 = vmatprep.mubr.f32.mxu0 %v4159_v22  ;;  %v3204_v9 = vsub.f32 %v318_v14, %v4460_v16 }
 0x17c   :  { %2107 = vmatprep.mubr.f32.mxu1 %v4159_v22  ;;  %v3199_v19 = vand.u32 4294901760, %v3198_v17 }
 0x17e   :  { %v3200_v26 = vsub.f32 %v3198_v17, %v3199_v19 }
 0x180   :  { %1644 = vmatmul.mubr.f32.vlgmr.msra.gmra.mrb[2].mxu0 %v4204_v54  ;;  %v3201_v29 = vand.u32 4294901760, %v3200_v26 }
 0x181   :  { %1653 = vmatpush1.msra.mxu0 %v4334_v24  ;;  %2109 = vmatmul.mubr.f32.vlgmr.msra.gmra.mrb[2].mxu1 %v4204_v54  ;;  %v3664_v24 = vand.u32 4294901760, %v3663_v18 }
 0x182   :  { %2118 = vmatpush1.msra.mxu1 %v4337_v25  ;;  %2190 = vmatprep.subr.mxu0 %v4385_v44  ;;  %v3205_v25 = vand.u32 4294901760, %v3204_v9 }
 0x183   :  { %2655 = vmatprep.subr.mxu1 %v4390_v46  ;;  %1716 = vmatprep.mubr.f32.mxu0 %v4159_v22  ;;  %v3665_v30 = vsub.f32 %v3663_v18, %v3664_v24 }
 0x184   :  { %2181 = vmatprep.mubr.f32.mxu1 %v4159_v22  ;;  %v3206_v28 = vsub.f32 %v3204_v9, %v3205_v25 }
 0x185   :  { %v3666_v32 = vand.u32 4294901760, %v3665_v30 }
 0x186   :  { %v3207_v33 = vand.u32 4294901760, %v3206_v28 }
 0x188   :  { %1718 = vmatmul.mubr.f32.vlgmr.msra.gmra.mrb[2].mxu0 %v4204_v54 }
 0x189   :  { %2183 = vmatmul.mubr.f32.vlgmr.msra.gmra.mrb[2].mxu1 %v4204_v54  ;;  %2192 = vmatpush1.msra.mxu0 %v4397_v48 }
 0x18a   :  { %2657 = vmatpush1.msra.mxu1 %v4400_v49  ;;  %2272 = vmatprep.subr.mxu0 %v2271_v2 }
 0x18b   :  { %2737 = vmatprep.subr.mxu1 %v2736_v56  ;;  %2255 = vmatprep.mubr.f32.mxu0 %v4159_v22 }
 0x18c   :  { %2720 = vmatprep.mubr.f32.mxu1 %v4159_v22  ;;  %2261 = vmatmul.mubr.f32.vlgmr.msra.gmra.mrb[4].mxu0 %v4241_v23 }
 0x18d   :  { %2278 = vmatpush1.msra.mxu0 %v2277_v3  ;;  %2726 = vmatmul.mubr.f32.vlgmr.msra.gmra.mrb[4].mxu1 %v4241_v23 }
 0x18e   :  { %2743 = vmatpush1.msra.mxu1 %v2742_v4  ;;  %2351 = vmatprep.subr.mxu0 %v2268_v50 }
 0x18f   :  { %2816 = vmatprep.subr.mxu1 %v2733_v51  ;;  %2341 = vmatprep.mubr.f32.mxu0 %v4159_v22 }
 0x190   :  { %2806 = vmatprep.mubr.f32.mxu1 %v4159_v22 }
 0x194   :  { %2343 = vmatmul.mubr.f32.vlgmr.msra.gmra.mrb[4].mxu0 %v4204_v54 }
 0x195   :  { %2354 = vmatpush1.msra.mxu0 %v2274_v52  ;;  %2808 = vmatmul.mubr.f32.vlgmr.msra.gmra.mrb[4].mxu1 %v4204_v54 }
 0x196   :  { %2819 = vmatpush1.msra.mxu1 %v4407_v53  ;;  %2427 = vmatprep.subr.mxu0 %v4385_v44 }
 0x197   :  { %2892 = vmatprep.subr.mxu1 %v4390_v46  ;;  %2417 = vmatprep.mubr.f32.mxu0 %v4159_v22 }
 0x198   :  { %2882 = vmatprep.mubr.f32.mxu1 %v4159_v22 }
 0x19c   :  { %2420 = vmatmul.mubr.f32.vlgmr.msra.gmra.mrb[4].mxu0 %v4214_v62 }
 0x19d   :  { %2429 = vmatpush1.msra.mxu0 %v4397_v48  ;;  %2885 = vmatmul.mubr.f32.vlgmr.msra.gmra.mrb[4].mxu1 %v4214_v62 }
 0x19e   :  { %2894 = vmatpush1.msra.mxu1 %v4400_v49  ;;  %2505 = vmatprep.subr.mxu0 %v2269_v57 }
 0x19f   :  { %2970 = vmatprep.subr.mxu1 %v2734_v58  ;;  %2492 = vmatprep.mubr.f32.mxu0 %v4159_v22 }
 0x1a0   :  { %2957 = vmatprep.mubr.f32.mxu1 %v4159_v22 }
 0x1a4   :  { %2496 = vmatmul.mubr.f32.vlgmr.msra.gmra.mrb[4].mxu0 %v4222_v5 }
 0x1a5   :  { %2509 = vmatpush1.msra.mxu0 %v2275_v59  ;;  %2961 = vmatmul.mubr.f32.vlgmr.msra.gmra.mrb[4].mxu1 %v4222_v5 }
 0x1a6   :  { %2974 = vmatpush1.msra.mxu1 %v2740_v63  ;;  %2581 = vmatprep.subr.mxu0 %v4385_v44 }
 0x1a7   :  { %3046 = vmatprep.subr.mxu1 %v4390_v46  ;;  %2572 = vmatprep.mubr.f32.mxu0 %v4159_v22 }
 0x1a8   :  { %3037 = vmatprep.mubr.f32.mxu1 %v4159_v22 }
 0x1ac   :  { %2574 = vmatmul.mubr.f32.vlgmr.msra.gmra.mrb[4].mxu0 %v4204_v54 }
 0x1ad   :  { %2583 = vmatpush1.msra.mxu0 %v4397_v48  ;;  %3039 = vmatmul.mubr.f32.vlgmr.msra.gmra.mrb[4].mxu1 %v4204_v54 }
 0x1ae   :  { %3048 = vmatpush1.msra.mxu1 %v4400_v49  ;;  %3120 = vmatprep.subr.mxu0 %v4448_v13 }
 0x1af   :  { %3585 = vmatprep.subr.mxu1 %v4453_v15  ;;  %2646 = vmatprep.mubr.f32.mxu0 %v4159_v22 }
 0x1b0   :  { %3111 = vmatprep.mubr.f32.mxu1 %v4159_v22 }
 0x1b4   :  { %2648 = vmatmul.mubr.f32.vlgmr.msra.gmra.mrb[4].mxu0 %v4204_v54 }
 0x1b5   :  { %3113 = vmatmul.mubr.f32.vlgmr.msra.gmra.mrb[4].mxu1 %v4204_v54  ;;  %3122 = vmatpush1.msra.mxu0 %v4460_v16 }
 0x1b6   :  { %3587 = vmatpush1.msra.mxu1 %v4463_v8  ;;  %3202 = vmatprep.subr.mxu0 %v3201_v29 }
 0x1b7   :  { %3667 = vmatprep.subr.mxu1 %v3666_v32  ;;  %3185 = vmatprep.mubr.f32.mxu0 %v4159_v22 }
 0x1b8   :  { %3650 = vmatprep.mubr.f32.mxu1 %v4159_v22  ;;  %3191 = vmatmul.mubr.f32.vlgmr.msra.gmra.mrb[6].mxu0 %v4241_v23 }
 0x1b9   :  { %3208 = vmatpush1.msra.mxu0 %v3207_v33  ;;  %3656 = vmatmul.mubr.f32.vlgmr.msra.gmra.mrb[6].mxu1 %v4241_v23 }
 0x1ba   :  { %3673 = vmatpush1.msra.mxu1 %v3672_v34  ;;  %3281 = vmatprep.subr.mxu0 %v3198_v17 }
 0x1bb   :  { %3746 = vmatprep.subr.mxu1 %v3663_v18  ;;  %3271 = vmatprep.mubr.f32.mxu0 %v4159_v22 }
 0x1bc   :  { %3736 = vmatprep.mubr.f32.mxu1 %v4159_v22 }
 0x1c0   :  { %3273 = vmatmul.mubr.f32.vlgmr.msra.gmra.mrb[6].mxu0 %v4204_v54 }
 0x1c1   :  { %3284 = vmatpush1.msra.mxu0 %v3204_v9  ;;  %3738 = vmatmul.mubr.f32.vlgmr.msra.gmra.mrb[6].mxu1 %v4204_v54 }
 0x1c2   :  { %3749 = vmatpush1.msra.mxu1 %v3669_v10  ;;  %3357 = vmatprep.subr.mxu0 %v4448_v13 }
 0x1c3   :  { %3822 = vmatprep.subr.mxu1 %v4453_v15  ;;  %3347 = vmatprep.mubr.f32.mxu0 %v4159_v22 }
 0x1c4   :  { %3812 = vmatprep.mubr.f32.mxu1 %v4159_v22 }
 0x1c8   :  { %3350 = vmatmul.mubr.f32.vlgmr.msra.gmra.mrb[6].mxu0 %v4214_v62 }
 0x1c9   :  { %3359 = vmatpush1.msra.mxu0 %v4460_v16  ;;  %3815 = vmatmul.mubr.f32.vlgmr.msra.gmra.mrb[6].mxu1 %v4214_v62 }
 0x1ca   :  { %3824 = vmatpush1.msra.mxu1 %v4463_v8  ;;  %3435 = vmatprep.subr.mxu0 %v3199_v19 }
 0x1cb   :  { %3900 = vmatprep.subr.mxu1 %v3664_v24  ;;  %3422 = vmatprep.mubr.f32.mxu0 %v4159_v22 }
 0x1cc   :  { %3887 = vmatprep.mubr.f32.mxu1 %v4159_v22 }
 0x1d0   :  { %3426 = vmatmul.mubr.f32.vlgmr.msra.gmra.mrb[6].mxu0 %v4222_v5 }
 0x1d1   :  { %3439 = vmatpush1.msra.mxu0 %v3205_v25  ;;  %3891 = vmatmul.mubr.f32.vlgmr.msra.gmra.mrb[6].mxu1 %v4222_v5 }
 0x1d2   :  { %3904 = vmatpush1.msra.mxu1 %v3670_v27  ;;  %3511 = vmatprep.subr.mxu0 %v4448_v13 }
 0x1d3   :  { %3976 = vmatprep.subr.mxu1 %v4453_v15  ;;  %3502 = vmatprep.mubr.f32.mxu0 %v4159_v22 }
 0x1d4   :  { %3967 = vmatprep.mubr.f32.mxu1 %v4159_v22 }
 0x1d8   :  { %3504 = vmatmul.mubr.f32.vlgmr.msra.gmra.mrb[6].mxu0 %v4204_v54 }
 0x1d9   :  { %3513 = vmatpush1.msra.mxu0 %v4460_v16  ;;  %3969 = vmatmul.mubr.f32.vlgmr.msra.gmra.mrb[6].mxu1 %v4204_v54 }
 0x1da   :  { %3978 = vmatpush1.msra.mxu1 %v4463_v8  ;;  %3576 = vmatprep.mubr.f32.mxu0 %v4159_v22 }
 0x1db   :  { %4041 = vmatprep.mubr.f32.mxu1 %v4159_v22 }
 0x1e0   :  { %3578 = vmatmul.mubr.f32.vlgmr.msra.gmra.mrb[6].mxu0 %v4204_v54 }
 0x1e1   :  { %4043 = vmatmul.mubr.f32.vlgmr.msra.gmra.mrb[6].mxu1 %v4204_v54 }
 0x22f   :  { %v789_v62 = vpop.f32.mrb[0].mxu0 }
 0x230   :  { %4049 = vst [vmem:[%s4564_s3] sm:$0xff] %v789_v62  ;;  %v1254_v5 = vpop.f32.mrb[0].mxu1  ;;  %v791_v23 = vpop.f32.mrb[1].mxu0 }
 0x231   :  { %4051 = vst [vmem:[%s4564_s3 + $0x10] sm:$0xff] %v1254_v5  ;;  %4050 = vst [vmem:[%s4564_s3 + $0x8] sm:$0xff] %v791_v23  ;;  %v1256_v22 = vpop.f32.mrb[1].mxu1 }
 0x232   :  { %4052 = vst [vmem:[%s4564_s3 + $0x18] sm:$0xff] %v1256_v22 }
 0x25b   :  { %v1719_v54 = vpop.f32.mrb[2].mxu0 }
 0x25c   :  { %4053 = vst [vmem:[%s4564_s3 + $0x20] sm:$0xff] %v1719_v54  ;;  %v2184_v35 = vpop.f32.mrb[2].mxu1  ;;  %v1721_v36 = vpop.f32.mrb[3].mxu0 }
 0x25d   :  { %4055 = vst [vmem:[%s4564_s3 + $0x30] sm:$0xff] %v2184_v35  ;;  %4054 = vst [vmem:[%s4564_s3 + $0x28] sm:$0xff] %v1721_v36  ;;  %v2186_v20 = vpop.f32.mrb[3].mxu1 }
 0x25e   :  { %4056 = vst [vmem:[%s4564_s3 + $0x38] sm:$0xff] %v2186_v20 }
 0x287   :  { %v2649_v37 = vpop.f32.mrb[4].mxu0 }
 0x288   :  { %4057 = vst [vmem:[%s4564_s3 + $0x40] sm:$0xff] %v2649_v37  ;;  %v3114_v21 = vpop.f32.mrb[4].mxu1  ;;  %v2651_v38 = vpop.f32.mrb[5].mxu0 }
 0x289   :  { %4059 = vst [vmem:[%s4564_s3 + $0x50] sm:$0xff] %v3114_v21  ;;  %4058 = vst [vmem:[%s4564_s3 + $0x48] sm:$0xff] %v2651_v38  ;;  %v3116_v39 = vpop.f32.mrb[5].mxu1 }
 0x28a   :  { %4060 = vst [vmem:[%s4564_s3 + $0x58] sm:$0xff] %v3116_v39 }
 0x2b3   :  { %v3579_v40 = vpop.f32.mrb[6].mxu0 }
 0x2b4   :  { %4061 = vst [vmem:[%s4564_s3 + $0x60] sm:$0xff] %v3579_v40  ;;  %v4044_v41 = vpop.f32.mrb[6].mxu1  ;;  %v3581_v42 = vpop.f32.mrb[7].mxu0 }
 0x2b5   :  { %4063 = vst [vmem:[%s4564_s3 + $0x70] sm:$0xff] %v4044_v41  ;;  %4062 = vst [vmem:[%s4564_s3 + $0x68] sm:$0xff] %v3581_v42  ;;  %v4046_v43 = vpop.f32.mrb[7].mxu1 }
 0x2b6   :  { %4064 = vst [vmem:[%s4564_s3 + $0x78] sm:$0xff] %v4046_v43 }

</bundles_post_ra>
